<compile_context>
chip_gen: v6e
topology: v6e:2x2x1
jax: 0.10.0
libtpu: 0.0.40
codegen_flags: <defaults>
</compile_context>

<pallas_src>
import functools

import numpy as np
import jax
import jax.numpy as jnp
from jax.experimental import pallas as pl
from jax.experimental.pallas import tpu as pltpu


# ----------------------------- Pallas kernel ------------------------------ #
def _up_kernel(x1_ref, x2_ref, up_ref, masks_ref, w1_ref, b1_ref, w2_ref,
               b2_ref, o_ref, *, N, H, W):
    """Fused: bilinear-2x upsample -> concat -> (conv3x3+BN+ReLU)*2, full batch.

    x1_ref   : (N, C1, h*w)     f32   low-res input, flattened spatial
    x2_ref   : (N, C2, H*W)     f32   skip connection, flattened spatial
    up_ref   : (h*w, H*W)       f32   per-image upsample(+pad) linear map
    masks_ref: (9, N*H*W)       f32   per-tap boundary masks (1 inside, 0 out)
    w1_ref   : (Cmid_p, 9*Cin)  bf16  conv1 weight, BN1 scale folded in
    b1_ref   : (Cmid_p, 1)      f32   conv1 folded bias
    w2_ref   : (Cout, 9*Cmid_p) bf16  conv2 weight, BN2 scale folded in
    b2_ref   : (Cout, 1)        f32   conv2 folded bias
    o_ref    : (N, Cout, H*W)   f32
    """
    HW = H * W
    L = N * HW
    masks = masks_ref[...]                                        # (9, L)

    # Bilinear 2x upsample + centered pad == one tiny matmul per image (f32),
    # results laid out along the lane axis: lanes [n*HW:(n+1)*HW] = image n.
    x1u = jnp.concatenate(
        [jnp.dot(x1_ref[n], up_ref[...], preferred_element_type=jnp.float32)
         for n in range(N)], axis=1)                              # (C1, L)
    x2c = jnp.concatenate([x2_ref[n] for n in range(N)], axis=1)  # (C2, L)
    xin = jnp.concatenate([x2c, x1u], axis=0)                     # (Cin, L)

    def im2col_bf16(v):
        # v: (C, L) f32 -> (9*C, L) bf16.  Tap order k = ky*3 + kx matches the
        # HWIO -> (9*C, Cout) weight reshape in the wrapper.  Lane shifts use
        # pltpu.roll (XLU vrot); out-of-image (and cross-image) taps are
        # zeroed by the precomputed masks, so SAME zero-padding is exact.
        pieces = []
        for ky in range(3):
            for kx in range(3):
                k = ky * 3 + kx
                off = (ky - 1) * W + (kx - 1)
                s = (-off) % L
                p = pltpu.roll(v, shift=s, axis=1) if s else v
                if not (ky == 1 and kx == 1):      # center tap needs no mask
                    p = p * masks[k:k + 1, :]
                pieces.append(p)
        return jnp.concatenate(pieces, axis=0).astype(jnp.bfloat16)

    # conv1 (3x3, SAME) as a single im2col matmul (bf16 x bf16 -> f32 acc).
    p1 = im2col_bf16(xin)                                         # (9*Cin, L)
    y1 = jnp.dot(w1_ref[...], p1, preferred_element_type=jnp.float32)
    y1 = jnp.maximum(y1 + b1_ref[...], 0.0)                       # (Cmid_p, L)

    # conv2 (3x3, SAME).
    p2 = im2col_bf16(y1)                                          # (9*Cmid_p, L)
    y2 = jnp.dot(w2_ref[...], p2, preferred_element_type=jnp.float32)
    y2 = jnp.maximum(y2 + b2_ref[...], 0.0)                       # (Cout, L)

    # Lane-dense stores, one HW-lane slab per image (no host-side transpose).
    for n in range(N):
        o_ref[n] = y2[:, n * HW:(n + 1) * HW].astype(o_ref.dtype)


# --------------------------- host-side constants --------------------------- #
def _upsample_pad_matrix(h, w, H, W):
    """(h*w, H*W) matrix: bilinear 2x upsample (align_corners=True) followed by
    the centered zero-pad used in Up.forward."""
    def lin(in_len, out_len):
        if out_len == 1 or in_len == 1:
            src = np.zeros((out_len,), np.float64)
        else:
            src = np.arange(out_len, dtype=np.float64) * (in_len - 1) / (out_len - 1)
        i0 = np.floor(src).astype(np.int64)
        i1 = np.minimum(i0 + 1, in_len - 1)
        f = src - i0
        m = np.zeros((out_len, in_len), np.float64)
        m[np.arange(out_len), i0] += 1.0 - f
        m[np.arange(out_len), i1] += f
        return m

    mh, mw = lin(h, 2 * h), lin(w, 2 * w)
    dY, dX = H - 2 * h, W - 2 * w
    mh_p = np.zeros((H, h), np.float64)
    mh_p[dY // 2: dY // 2 + 2 * h, :] = mh
    mw_p = np.zeros((W, w), np.float64)
    mw_p[dX // 2: dX // 2 + 2 * w, :] = mw
    k = np.kron(mh_p, mw_p)                                   # (H*W, h*w)
    return jnp.asarray(k.T, dtype=jnp.float32)                # (h*w, H*W)


def _tap_masks(H, W, N):
    """(9, N*H*W) 0/1 masks: tap (ky, kx) is valid where (y+ky-1, x+kx-1) is
    inside the image (implements the conv's SAME zero padding; also zeroes any
    cross-image bleed from the full-lane-axis rolls)."""
    p = np.arange(H * W)
    y, x = p // W, p % W
    m = np.ones((9, H * W), np.float32)
    for ky in range(3):
        for kx in range(3):
            yy, xx = y + ky - 1, x + kx - 1
            ok = (yy >= 0) & (yy < H) & (xx >= 0) & (xx < W)
            m[ky * 3 + kx] = ok.astype(np.float32)
    return jnp.asarray(np.tile(m, (1, N)))


def fold_bn(gamma, beta, mean, var, eps=1e-5):
    scale = gamma / jnp.sqrt(var + eps)
    return scale, beta - mean * scale


# -------------------------------- wrapper ---------------------------------- #
def up_forward(x1_nchw, x2_nchw, params):
    """Up.forward(x1, x2); inputs/outputs are NCHW like the PyTorch module."""
    w1, s1, b1, w2, s2, b2 = params
    N, C1, h, w = x1_nchw.shape
    N2, C2, H, W = x2_nchw.shape
    assert N2 == N
    hw, HW = h * w, H * W
    L = N * HW
    Cin = C1 + C2
    Cmid = w1.shape[-1]
    Cout = w2.shape[-1]
    Cmid_p = max(8, ((Cmid + 7) // 8) * 8)   # pad mid channels to a sublane group

    # Constants / parameter prep (tiny, host side).  MXU weight operands bf16.
    up = _upsample_pad_matrix(h, w, H, W)                     # (hw, HW) f32
    masks = _tap_masks(H, W, N)                               # (9, L)  f32

    w1m = (w1 * s1[None, None, None, :]).reshape(9 * Cin, Cmid).T
    w1m = jnp.pad(w1m, ((0, Cmid_p - Cmid), (0, 0))).astype(jnp.bfloat16)
    b1v = jnp.pad(b1, (0, Cmid_p - Cmid)).reshape(Cmid_p, 1)
    w2p = jnp.pad(w2 * s2[None, None, None, :],
                  ((0, 0), (0, 0), (0, Cmid_p - Cmid), (0, 0)))
    w2m = w2p.reshape(9 * Cmid_p, Cout).T.astype(jnp.bfloat16)  # (Cout, 9*Cmid_p)
    b2v = b2.reshape(Cout, 1)

    # Flattened-spatial NCHW views (free reshapes, no transposes, no HBM glue).
    x1f = x1_nchw.reshape(N, C1, hw)
    x2f = x2_nchw.reshape(N, C2, HW)

    out = pl.pallas_call(
        functools.partial(_up_kernel, N=N, H=H, W=W),
        out_shape=jax.ShapeDtypeStruct((N, Cout, HW), jnp.float32),
        grid_spec=pltpu.PrefetchScalarGridSpec(
            num_scalar_prefetch=0,
            grid=(1,),   # whole batch in one step: lanes carry N*H*W
            in_specs=[
                pl.BlockSpec((N, C1, hw), lambda i: (0, 0, 0)),
                pl.BlockSpec((N, C2, HW), lambda i: (0, 0, 0)),
                pl.BlockSpec((hw, HW), lambda i: (0, 0)),
                pl.BlockSpec((9, L), lambda i: (0, 0)),
                pl.BlockSpec((Cmid_p, 9 * Cin), lambda i: (0, 0)),
                pl.BlockSpec((Cmid_p, 1), lambda i: (0, 0)),
                pl.BlockSpec((Cout, 9 * Cmid_p), lambda i: (0, 0)),
                pl.BlockSpec((Cout, 1), lambda i: (0, 0)),
            ],
            out_specs=pl.BlockSpec((N, Cout, HW), lambda i: (0, 0, 0)),
        ),
        compiler_params=pltpu.CompilerParams(
            dimension_semantics=("arbitrary",)),
    )(x1f, x2f, up, masks, w1m, b1v, w2m, b2v)

    return out.reshape(N, Cout, H, W)


# ---------------------------- pure-JAX reference --------------------------- #
def _bilinear_up2_align_corners_nchw(x):
    N, C, H, W = x.shape
    OH, OW = 2 * H, 2 * W

    def src(out_len, in_len):
        if out_len == 1 or in_len == 1:
            return jnp.zeros((out_len,), jnp.float32)
        return jnp.arange(out_len, dtype=jnp.float32) * (in_len - 1) / (out_len - 1)

    ys, xs = src(OH, H), src(OW, W)
    y0 = jnp.floor(ys).astype(jnp.int32)
    y1 = jnp.minimum(y0 + 1, H - 1)
    wy = (ys - y0.astype(jnp.float32))[None, None, :, None]
    x0 = jnp.floor(xs).astype(jnp.int32)
    x1 = jnp.minimum(x0 + 1, W - 1)
    wx = (xs - x0.astype(jnp.float32))[None, None, None, :]

    v = x[:, :, y0, :] * (1.0 - wy) + x[:, :, y1, :] * wy
    return v[:, :, :, x0] * (1.0 - wx) + v[:, :, :, x1] * wx


def up_forward_ref(x1_nchw, x2_nchw, params):
    w1, s1, b1, w2, s2, b2 = params
    x1u = _bilinear_up2_align_corners_nchw(x1_nchw)
    diffY = x2_nchw.shape[2] - x1u.shape[2]
    diffX = x2_nchw.shape[3] - x1u.shape[3]
    x1u = jnp.pad(x1u, ((0, 0), (0, 0),
                        (diffY // 2, diffY - diffY // 2),
                        (diffX // 2, diffX - diffX // 2)))
    x = jnp.concatenate([x2_nchw, x1u], axis=1)

    def conv(v, wgt):
        return jax.lax.conv_general_dilated(
            v, wgt, window_strides=(1, 1), padding="SAME",
            dimension_numbers=("NCHW", "HWIO", "NCHW"))

    y = jnp.maximum(conv(x, w1) * s1[None, :, None, None]
                    + b1[None, :, None, None], 0.0)
    return jnp.maximum(conv(y, w2) * s2[None, :, None, None]
                       + b2[None, :, None, None], 0.0)


# ----------------------------------- main ---------------------------------- #
if __name__ == "__main__":
    key = jax.random.PRNGKey(0)
    k1, k2, k3, k4 = jax.random.split(key, 4)

    # Up(in_channels=8, out_channels=8, bilinear=True):
    #   x1: (N, 4, 8, 8)   -> upsampled 2x to 16x16
    #   x2: (N, 4, 16, 16)
    #   concat -> 8 channels; DoubleConv(8, 8, mid_channels=4)
    N = 2
    C1, C2 = 4, 4
    in_channels = C1 + C2            # 8
    mid_channels = in_channels // 2  # 4
    out_channels = 8

    x1 = jax.random.normal(k1, (N, C1, 8, 8), dtype=jnp.float32)
    x2 = jax.random.normal(k2, (N, C2, 16, 16), dtype=jnp.float32)

    # Deterministic synthetic parameters (HWIO conv weights).
    w1 = 0.1 * jax.random.normal(k3, (3, 3, in_channels, mid_channels),
                                 dtype=jnp.float32)
    w2 = 0.1 * jax.random.normal(k4, (3, 3, mid_channels, out_channels),
                                 dtype=jnp.float32)

    g1 = 1.0 + 0.05 * jnp.arange(mid_channels, dtype=jnp.float32)
    be1 = 0.01 * jnp.arange(mid_channels, dtype=jnp.float32)
    m1 = 0.02 * jnp.arange(mid_channels, dtype=jnp.float32)
    v1 = 1.0 + 0.10 * jnp.arange(mid_channels, dtype=jnp.float32)
    s1, b1 = fold_bn(g1, be1, m1, v1)

    g2 = 1.0 + 0.03 * jnp.arange(out_channels, dtype=jnp.float32)
    be2 = -0.02 * jnp.arange(out_channels, dtype=jnp.float32)
    m2 = 0.01 * jnp.arange(out_channels, dtype=jnp.float32)
    v2 = 1.0 + 0.05 * jnp.arange(out_channels, dtype=jnp.float32)
    s2, b2 = fold_bn(g2, be2, m2, v2)

    params = (w1, s1, b1, w2, s2, b2)

    out = jax.block_until_ready(up_forward(x1, x2, params))
    ref = jax.block_until_ready(up_forward_ref(x1, x2, params))

    assert out.shape == (N, out_channels, 16, 16), out.shape
    # Tolerance loosened vs the pure-f32 version: conv MXU operands are bf16
    # (f32 accumulation), per the performance review.
    assert jnp.max(jnp.abs(out - ref)) < 5e-2, float(jnp.max(jnp.abs(out - ref)))
    print("KERNEL_OK")
</pallas_src>

<mosaic_0001>
module attributes {stable_mosaic.version = 11 : i64} {
  func.func @_up_kernel(%arg0: i32, %arg1: memref<2x4x64xf32, #tpu.memory_space<vmem>>, %arg2: memref<2x4x256xf32, #tpu.memory_space<vmem>>, %arg3: memref<64x256xf32, #tpu.memory_space<vmem>>, %arg4: memref<9x512xf32, #tpu.memory_space<vmem>>, %arg5: memref<8x72xbf16, #tpu.memory_space<vmem>>, %arg6: memref<8x1xf32, #tpu.memory_space<vmem>>, %arg7: memref<8x72xbf16, #tpu.memory_space<vmem>>, %arg8: memref<8x1xf32, #tpu.memory_space<vmem>>, %arg9: memref<2x8x256xf32, #tpu.memory_space<vmem>>) attributes {dimension_semantics = [#tpu.dimension_semantics<arbitrary>], iteration_bounds = array<i64: 1>, scalar_prefetch = 0 : i64, scratch_operands = 0 : i64, tpu.core_type = #tpu.core_type<tc>, window_params = [{pipeline_mode = #tpu.pipeline_mode<synchronous>, transform_indices = @transform_0, window_bounds = array<i64: 2, 4, 64>}, {pipeline_mode = #tpu.pipeline_mode<synchronous>, transform_indices = @transform_1, window_bounds = array<i64: 2, 4, 256>}, {pipeline_mode = #tpu.pipeline_mode<synchronous>, transform_indices = @transform_2, window_bounds = array<i64: 64, 256>}, {pipeline_mode = #tpu.pipeline_mode<synchronous>, transform_indices = @transform_3, window_bounds = array<i64: 9, 512>}, {pipeline_mode = #tpu.pipeline_mode<synchronous>, transform_indices = @transform_4, window_bounds = array<i64: 8, 72>}, {pipeline_mode = #tpu.pipeline_mode<synchronous>, transform_indices = @transform_5, window_bounds = array<i64: 8, 1>}, {pipeline_mode = #tpu.pipeline_mode<synchronous>, transform_indices = @transform_6, window_bounds = array<i64: 8, 72>}, {pipeline_mode = #tpu.pipeline_mode<synchronous>, transform_indices = @transform_7, window_bounds = array<i64: 8, 1>}, {pipeline_mode = #tpu.pipeline_mode<synchronous>, transform_indices = @transform_8, window_bounds = array<i64: 2, 8, 256>}]} {
    %c0 = arith.constant 0 : index
    %c0_0 = arith.constant 0 : index
    %0 = vector.load %arg4[%c0, %c0_0] : memref<9x512xf32, #tpu.memory_space<vmem>>, vector<9x512xf32>
    %c0_1 = arith.constant 0 : index
    %c0_2 = arith.constant 0 : index
    %c0_3 = arith.constant 0 : index
    %1 = vector.load %arg1[%c0_1, %c0_2, %c0_3] : memref<2x4x64xf32, #tpu.memory_space<vmem>>, vector<1x4x64xf32>
    %2 = vector.shape_cast %1 : vector<1x4x64xf32> to vector<4x64xf32>
    %c0_4 = arith.constant 0 : index
    %c0_5 = arith.constant 0 : index
    %3 = vector.load %arg3[%c0_4, %c0_5] : memref<64x256xf32, #tpu.memory_space<vmem>>, vector<64x256xf32>
    %cst = arith.constant dense<0.000000e+00> : vector<4x256xf32>
    %4 = tpu.matmul %2, %3, %cst {dimension_numbers = #tpu.dot_dimension_numbers<[1], [0], [0], [1], [0, 0, 1, 1], [], []>} : vector<4x64xf32>, vector<64x256xf32>, vector<4x256xf32> -> vector<4x256xf32>
    %c1 = arith.constant 1 : index
    %c0_6 = arith.constant 0 : index
    %c0_7 = arith.constant 0 : index
    %5 = vector.load %arg1[%c1, %c0_6, %c0_7] : memref<2x4x64xf32, #tpu.memory_space<vmem>>, vector<1x4x64xf32>
    %6 = vector.shape_cast %5 : vector<1x4x64xf32> to vector<4x64xf32>
    %c0_8 = arith.constant 0 : index
    %c0_9 = arith.constant 0 : index
    %7 = vector.load %arg3[%c0_8, %c0_9] : memref<64x256xf32, #tpu.memory_space<vmem>>, vector<64x256xf32>
    %cst_10 = arith.constant dense<0.000000e+00> : vector<4x256xf32>
    %8 = tpu.matmul %6, %7, %cst_10 {dimension_numbers = #tpu.dot_dimension_numbers<[1], [0], [0], [1], [0, 0, 1, 1], [], []>} : vector<4x64xf32>, vector<64x256xf32>, vector<4x256xf32> -> vector<4x256xf32>
    %9 = tpu.concatenate %4, %8 in 1 : vector<4x256xf32>, vector<4x256xf32> -> vector<4x512xf32>
    %c0_11 = arith.constant 0 : index
    %c0_12 = arith.constant 0 : index
    %c0_13 = arith.constant 0 : index
    %10 = vector.load %arg2[%c0_11, %c0_12, %c0_13] : memref<2x4x256xf32, #tpu.memory_space<vmem>>, vector<1x4x256xf32>
    %11 = vector.shape_cast %10 : vector<1x4x256xf32> to vector<4x256xf32>
    %c1_14 = arith.constant 1 : index
    %c0_15 = arith.constant 0 : index
    %c0_16 = arith.constant 0 : index
    %12 = vector.load %arg2[%c1_14, %c0_15, %c0_16] : memref<2x4x256xf32, #tpu.memory_space<vmem>>, vector<1x4x256xf32>
    %13 = vector.shape_cast %12 : vector<1x4x256xf32> to vector<4x256xf32>
    %14 = tpu.concatenate %11, %13 in 1 : vector<4x256xf32>, vector<4x256xf32> -> vector<4x512xf32>
    %15 = tpu.concatenate %14, %9 in 0 : vector<4x512xf32>, vector<4x512xf32> -> vector<8x512xf32>
    %c17_i32 = arith.constant 17 : i32
    %16 = tpu.dynamic_rotate %15 by %c17_i32 dim 1 : vector<8x512xf32>, i32 -> vector<8x512xf32>
    %17 = vector.extract_strided_slice %0 {offsets = [0, 0], sizes = [1, 512], strides = [1, 1]} : vector<9x512xf32> to vector<1x512xf32>
    %18 = vector.broadcast %17 : vector<1x512xf32> to vector<8x512xf32>
    %19 = arith.mulf %16, %18 : vector<8x512xf32>
    %c16_i32 = arith.constant 16 : i32
    %20 = tpu.dynamic_rotate %15 by %c16_i32 dim 1 : vector<8x512xf32>, i32 -> vector<8x512xf32>
    %21 = vector.extract_strided_slice %0 {offsets = [1, 0], sizes = [1, 512], strides = [1, 1]} : vector<9x512xf32> to vector<1x512xf32>
    %22 = vector.broadcast %21 : vector<1x512xf32> to vector<8x512xf32>
    %23 = arith.mulf %20, %22 : vector<8x512xf32>
    %c15_i32 = arith.constant 15 : i32
    %24 = tpu.dynamic_rotate %15 by %c15_i32 dim 1 : vector<8x512xf32>, i32 -> vector<8x512xf32>
    %25 = vector.extract_strided_slice %0 {offsets = [2, 0], sizes = [1, 512], strides = [1, 1]} : vector<9x512xf32> to vector<1x512xf32>
    %26 = vector.broadcast %25 : vector<1x512xf32> to vector<8x512xf32>
    %27 = arith.mulf %24, %26 : vector<8x512xf32>
    %c1_i32 = arith.constant 1 : i32
    %28 = tpu.dynamic_rotate %15 by %c1_i32 dim 1 : vector<8x512xf32>, i32 -> vector<8x512xf32>
    %29 = vector.extract_strided_slice %0 {offsets = [3, 0], sizes = [1, 512], strides = [1, 1]} : vector<9x512xf32> to vector<1x512xf32>
    %30 = vector.broadcast %29 : vector<1x512xf32> to vector<8x512xf32>
    %31 = arith.mulf %28, %30 : vector<8x512xf32>
    %c511_i32 = arith.constant 511 : i32
    %32 = tpu.dynamic_rotate %15 by %c511_i32 dim 1 : vector<8x512xf32>, i32 -> vector<8x512xf32>
    %33 = vector.extract_strided_slice %0 {offsets = [5, 0], sizes = [1, 512], strides = [1, 1]} : vector<9x512xf32> to vector<1x512xf32>
    %34 = vector.broadcast %33 : vector<1x512xf32> to vector<8x512xf32>
    %35 = arith.mulf %32, %34 : vector<8x512xf32>
    %c497_i32 = arith.constant 497 : i32
    %36 = tpu.dynamic_rotate %15 by %c497_i32 dim 1 : vector<8x512xf32>, i32 -> vector<8x512xf32>
    %37 = vector.extract_strided_slice %0 {offsets = [6, 0], sizes = [1, 512], strides = [1, 1]} : vector<9x512xf32> to vector<1x512xf32>
    %38 = vector.broadcast %37 : vector<1x512xf32> to vector<8x512xf32>
    %39 = arith.mulf %36, %38 : vector<8x512xf32>
    %c496_i32 = arith.constant 496 : i32
    %40 = tpu.dynamic_rotate %15 by %c496_i32 dim 1 : vector<8x512xf32>, i32 -> vector<8x512xf32>
    %41 = vector.extract_strided_slice %0 {offsets = [7, 0], sizes = [1, 512], strides = [1, 1]} : vector<9x512xf32> to vector<1x512xf32>
    %42 = vector.broadcast %41 : vector<1x512xf32> to vector<8x512xf32>
    %43 = arith.mulf %40, %42 : vector<8x512xf32>
    %c495_i32 = arith.constant 495 : i32
    %44 = tpu.dynamic_rotate %15 by %c495_i32 dim 1 : vector<8x512xf32>, i32 -> vector<8x512xf32>
    %45 = vector.extract_strided_slice %0 {offsets = [8, 0], sizes = [1, 512], strides = [1, 1]} : vector<9x512xf32> to vector<1x512xf32>
    %46 = vector.broadcast %45 : vector<1x512xf32> to vector<8x512xf32>
    %47 = arith.mulf %44, %46 : vector<8x512xf32>
    %48 = tpu.concatenate %19, %23, %27, %31, %15, %35, %39, %43, %47 in 0 : vector<8x512xf32>, vector<8x512xf32>, vector<8x512xf32>, vector<8x512xf32>, vector<8x512xf32>, vector<8x512xf32>, vector<8x512xf32>, vector<8x512xf32>, vector<8x512xf32> -> vector<72x512xf32>
    %49 = arith.truncf %48 : vector<72x512xf32> to vector<72x512xbf16>
    %c0_17 = arith.constant 0 : index
    %c0_18 = arith.constant 0 : index
    %50 = vector.load %arg5[%c0_17, %c0_18] : memref<8x72xbf16, #tpu.memory_space<vmem>>, vector<8x72xbf16>
    %cst_19 = arith.constant dense<0.000000e+00> : vector<8x512xf32>
    %51 = tpu.matmul %50, %49, %cst_19 {dimension_numbers = #tpu.dot_dimension_numbers<[1], [0], [0], [1], [0, 0, 1, 1], [], []>} : vector<8x72xbf16>, vector<72x512xbf16>, vector<8x512xf32> -> vector<8x512xf32>
    %c0_20 = arith.constant 0 : index
    %c0_21 = arith.constant 0 : index
    %52 = vector.load %arg6[%c0_20, %c0_21] : memref<8x1xf32, #tpu.memory_space<vmem>>, vector<8x1xf32>
    %53 = vector.broadcast %52 : vector<8x1xf32> to vector<8x512xf32>
    %54 = arith.addf %51, %53 : vector<8x512xf32>
    %cst_22 = arith.constant 0.000000e+00 : f32
    %55 = vector.broadcast %cst_22 : f32 to vector<8x512xf32>
    %56 = arith.maximumf %54, %55 : vector<8x512xf32>
    %c17_i32_23 = arith.constant 17 : i32
    %57 = tpu.dynamic_rotate %56 by %c17_i32_23 dim 1 : vector<8x512xf32>, i32 -> vector<8x512xf32>
    %58 = vector.extract_strided_slice %0 {offsets = [0, 0], sizes = [1, 512], strides = [1, 1]} : vector<9x512xf32> to vector<1x512xf32>
    %59 = vector.broadcast %58 : vector<1x512xf32> to vector<8x512xf32>
    %60 = arith.mulf %57, %59 : vector<8x512xf32>
    %c16_i32_24 = arith.constant 16 : i32
    %61 = tpu.dynamic_rotate %56 by %c16_i32_24 dim 1 : vector<8x512xf32>, i32 -> vector<8x512xf32>
    %62 = vector.extract_strided_slice %0 {offsets = [1, 0], sizes = [1, 512], strides = [1, 1]} : vector<9x512xf32> to vector<1x512xf32>
    %63 = vector.broadcast %62 : vector<1x512xf32> to vector<8x512xf32>
    %64 = arith.mulf %61, %63 : vector<8x512xf32>
    %c15_i32_25 = arith.constant 15 : i32
    %65 = tpu.dynamic_rotate %56 by %c15_i32_25 dim 1 : vector<8x512xf32>, i32 -> vector<8x512xf32>
    %66 = vector.extract_strided_slice %0 {offsets = [2, 0], sizes = [1, 512], strides = [1, 1]} : vector<9x512xf32> to vector<1x512xf32>
    %67 = vector.broadcast %66 : vector<1x512xf32> to vector<8x512xf32>
    %68 = arith.mulf %65, %67 : vector<8x512xf32>
    %c1_i32_26 = arith.constant 1 : i32
    %69 = tpu.dynamic_rotate %56 by %c1_i32_26 dim 1 : vector<8x512xf32>, i32 -> vector<8x512xf32>
    %70 = vector.extract_strided_slice %0 {offsets = [3, 0], sizes = [1, 512], strides = [1, 1]} : vector<9x512xf32> to vector<1x512xf32>
    %71 = vector.broadcast %70 : vector<1x512xf32> to vector<8x512xf32>
    %72 = arith.mulf %69, %71 : vector<8x512xf32>
    %c511_i32_27 = arith.constant 511 : i32
    %73 = tpu.dynamic_rotate %56 by %c511_i32_27 dim 1 : vector<8x512xf32>, i32 -> vector<8x512xf32>
    %74 = vector.extract_strided_slice %0 {offsets = [5, 0], sizes = [1, 512], strides = [1, 1]} : vector<9x512xf32> to vector<1x512xf32>
    %75 = vector.broadcast %74 : vector<1x512xf32> to vector<8x512xf32>
    %76 = arith.mulf %73, %75 : vector<8x512xf32>
    %c497_i32_28 = arith.constant 497 : i32
    %77 = tpu.dynamic_rotate %56 by %c497_i32_28 dim 1 : vector<8x512xf32>, i32 -> vector<8x512xf32>
    %78 = vector.extract_strided_slice %0 {offsets = [6, 0], sizes = [1, 512], strides = [1, 1]} : vector<9x512xf32> to vector<1x512xf32>
    %79 = vector.broadcast %78 : vector<1x512xf32> to vector<8x512xf32>
    %80 = arith.mulf %77, %79 : vector<8x512xf32>
    %c496_i32_29 = arith.constant 496 : i32
    %81 = tpu.dynamic_rotate %56 by %c496_i32_29 dim 1 : vector<8x512xf32>, i32 -> vector<8x512xf32>
    %82 = vector.extract_strided_slice %0 {offsets = [7, 0], sizes = [1, 512], strides = [1, 1]} : vector<9x512xf32> to vector<1x512xf32>
    %83 = vector.broadcast %82 : vector<1x512xf32> to vector<8x512xf32>
    %84 = arith.mulf %81, %83 : vector<8x512xf32>
    %c495_i32_30 = arith.constant 495 : i32
    %85 = tpu.dynamic_rotate %56 by %c495_i32_30 dim 1 : vector<8x512xf32>, i32 -> vector<8x512xf32>
    %86 = vector.extract_strided_slice %0 {offsets = [8, 0], sizes = [1, 512], strides = [1, 1]} : vector<9x512xf32> to vector<1x512xf32>
    %87 = vector.broadcast %86 : vector<1x512xf32> to vector<8x512xf32>
    %88 = arith.mulf %85, %87 : vector<8x512xf32>
    %89 = tpu.concatenate %60, %64, %68, %72, %56, %76, %80, %84, %88 in 0 : vector<8x512xf32>, vector<8x512xf32>, vector<8x512xf32>, vector<8x512xf32>, vector<8x512xf32>, vector<8x512xf32>, vector<8x512xf32>, vector<8x512xf32>, vector<8x512xf32> -> vector<72x512xf32>
    %90 = arith.truncf %89 : vector<72x512xf32> to vector<72x512xbf16>
    %c0_31 = arith.constant 0 : index
    %c0_32 = arith.constant 0 : index
    %91 = vector.load %arg7[%c0_31, %c0_32] : memref<8x72xbf16, #tpu.memory_space<vmem>>, vector<8x72xbf16>
    %cst_33 = arith.constant dense<0.000000e+00> : vector<8x512xf32>
    %92 = tpu.matmul %91, %90, %cst_33 {dimension_numbers = #tpu.dot_dimension_numbers<[1], [0], [0], [1], [0, 0, 1, 1], [], []>} : vector<8x72xbf16>, vector<72x512xbf16>, vector<8x512xf32> -> vector<8x512xf32>
    %c0_34 = arith.constant 0 : index
    %c0_35 = arith.constant 0 : index
    %93 = vector.load %arg8[%c0_34, %c0_35] : memref<8x1xf32, #tpu.memory_space<vmem>>, vector<8x1xf32>
    %94 = vector.broadcast %93 : vector<8x1xf32> to vector<8x512xf32>
    %95 = arith.addf %92, %94 : vector<8x512xf32>
    %cst_36 = arith.constant 0.000000e+00 : f32
    %96 = vector.broadcast %cst_36 : f32 to vector<8x512xf32>
    %97 = arith.maximumf %95, %96 : vector<8x512xf32>
    %98 = vector.extract_strided_slice %97 {offsets = [0, 0], sizes = [8, 256], strides = [1, 1]} : vector<8x512xf32> to vector<8x256xf32>
    %c0_37 = arith.constant 0 : index
    %c0_38 = arith.constant 0 : index
    %c0_39 = arith.constant 0 : index
    %99 = vector.load %arg9[%c0_37, %c0_38, %c0_39] : memref<2x8x256xf32, #tpu.memory_space<vmem>>, vector<1x8x256xf32>
    %100 = vector.shape_cast %99 : vector<1x8x256xf32> to vector<8x256xf32>
    %101 = vector.shape_cast %98 : vector<8x256xf32> to vector<1x8x256xf32>
    tpu.vector_store %arg9[%c0_37, %c0_38, %c0_39], %101 {strides = array<i32>} : memref<2x8x256xf32, #tpu.memory_space<vmem>>, vector<1x8x256xf32>,
    %102 = vector.extract_strided_slice %97 {offsets = [0, 256], sizes = [8, 256], strides = [1, 1]} : vector<8x512xf32> to vector<8x256xf32>
    %c1_40 = arith.constant 1 : index
    %c0_41 = arith.constant 0 : index
    %c0_42 = arith.constant 0 : index
    %103 = vector.load %arg9[%c1_40, %c0_41, %c0_42] : memref<2x8x256xf32, #tpu.memory_space<vmem>>, vector<1x8x256xf32>
    %104 = vector.shape_cast %103 : vector<1x8x256xf32> to vector<8x256xf32>
    %105 = vector.shape_cast %102 : vector<8x256xf32> to vector<1x8x256xf32>
    tpu.vector_store %arg9[%c1_40, %c0_41, %c0_42], %105 {strides = array<i32>} : memref<2x8x256xf32, #tpu.memory_space<vmem>>, vector<1x8x256xf32>,
    return
  }
  func.func @transform_0(%arg0: i32) -> (i32, i32, i32) {
    %c0_i32 = arith.constant 0 : i32
    %c0_i32_0 = arith.constant 0 : i32
    %c0_i32_1 = arith.constant 0 : i32
    %c0_i32_2 = arith.constant 0 : i32
    return %c0_i32, %c0_i32_0, %c0_i32_1 : i32, i32, i32
  }
  func.func @transform_1(%arg0: i32) -> (i32, i32, i32) {
    %c0_i32 = arith.constant 0 : i32
    %c0_i32_0 = arith.constant 0 : i32
    %c0_i32_1 = arith.constant 0 : i32
    %c0_i32_2 = arith.constant 0 : i32
    return %c0_i32, %c0_i32_0, %c0_i32_1 : i32, i32, i32
  }
  func.func @transform_2(%arg0: i32) -> (i32, i32) {
    %c0_i32 = arith.constant 0 : i32
    %c0_i32_0 = arith.constant 0 : i32
    %c0_i32_1 = arith.constant 0 : i32
    return %c0_i32, %c0_i32_0 : i32, i32
  }
  func.func @transform_3(%arg0: i32) -> (i32, i32) {
    %c0_i32 = arith.constant 0 : i32
    %c0_i32_0 = arith.constant 0 : i32
    %c0_i32_1 = arith.constant 0 : i32
    return %c0_i32, %c0_i32_0 : i32, i32
  }
  func.func @transform_4(%arg0: i32) -> (i32, i32) {
    %c0_i32 = arith.constant 0 : i32
    %c0_i32_0 = arith.constant 0 : i32
    %c0_i32_1 = arith.constant 0 : i32
    return %c0_i32, %c0_i32_0 : i32, i32
  }
  func.func @transform_5(%arg0: i32) -> (i32, i32) {
    %c0_i32 = arith.constant 0 : i32
    %c0_i32_0 = arith.constant 0 : i32
    %c0_i32_1 = arith.constant 0 : i32
    return %c0_i32, %c0_i32_0 : i32, i32
  }
  func.func @transform_6(%arg0: i32) -> (i32, i32) {
    %c0_i32 = arith.constant 0 : i32
    %c0_i32_0 = arith.constant 0 : i32
    %c0_i32_1 = arith.constant 0 : i32
    return %c0_i32, %c0_i32_0 : i32, i32
  }
  func.func @transform_7(%arg0: i32) -> (i32, i32) {
    %c0_i32 = arith.constant 0 : i32
    %c0_i32_0 = arith.constant 0 : i32
    %c0_i32_1 = arith.constant 0 : i32
    return %c0_i32, %c0_i32_0 : i32, i32
  }
  func.func @transform_8(%arg0: i32) -> (i32, i32, i32) {
    %c0_i32 = arith.constant 0 : i32
    %c0_i32_0 = arith.constant 0 : i32
    %c0_i32_1 = arith.constant 0 : i32
    %c0_i32_2 = arith.constant 0 : i32
    return %c0_i32, %c0_i32_0, %c0_i32_1 : i32, i32, i32
  }
}

</mosaic_0001>

<bundles_post_ra>
// kernel: tpu_custom_call.1
= control target key start
LH: loop header
LB: loop body
LE: loop exit
PB: predicated region body
PF: predicated region fallthrough
CT: control target
= control target key end

     0   :  { %13 = vsyncpa [#allocation3], 0  ;;  %s1711_s0 = inlined_call_operand.hbm [shape: f32[2,4,64], index: 0, kind: input, shape index: {}]   ;;  %s1712_s1 = inlined_call_operand.vmem [shape: f32[2,4,256], index: 1, kind: input, shape index: {}]   ;;  %s1713_s2 = inlined_call_operand.hbm [shape: f32[64,256], index: 2, kind: input, shape index: {}]   ;;  %s1714_s3 = inlined_call_operand.hbm [shape: f32[9,512], index: 3, kind: input, shape index: {}]   ;;  %s1715_s4 = inlined_call_operand.vmem [shape: bf16[8,72], index: 4, kind: input, shape index: {}]   ;;  %s1716_s5 = inlined_call_operand.vmem [shape: f32[8,1], index: 5, kind: input, shape index: {}]   ;;  %s1717_s6 = inlined_call_operand.vmem [shape: bf16[8,72], index: 6, kind: input, shape index: {}]   ;;  %s1718_s7 = inlined_call_operand.vmem [shape: f32[8,1], index: 7, kind: input, shape index: {}]   ;;  %s1719_s8 = inlined_call_operand.hbm [shape: f32[2,8,256], index: 8, kind: output, shape index: {}]  }
   0x1   :  { %14 = vsyncpa [#allocation6], 0 }
   0x2   :  { %15 = vsyncpa [#allocation4], 0  ;;  %s1071_s27 = smov [#allocation5]  }
   0x3   :  { %s35_s28 = sshll.u32 %s1071_s27, 4  ;;  %s36_s28 = int_to_ptr.vmem [resolvable:$true] %s35_s28 }
   0x4   :  { %s993_s29 = scalar_lea.vmem %s36_s28, 2048  ;;  %p998_p1 = scmp.lt.s32.totalorder %s36_s28, %s36_s28 }
   0x5   :  { %p994_p0 = scmp.ne.s32.totalorder %s36_s28, %s993_s29  ;;  %p999_p2 = scmp.lt.s32.totalorder %s993_s29, %s993_s29 }
   0x7   :  { %p1000_p3 = por %p999_p2, %p998_p1 }
   0x9   :  { %p1001_p4 = pnand %p1000_p3, %p994_p0 }
   0xb   :  { %1004 = shalt.err (!%p1001_p4)
}
   0xc   :  { %s1072_s30 = smov 256   ;;  %s1073_s9 = smov 16  }
   0xd   :  { %41 = dma.hbm_to_vmem [thread:$0]  %s1713_s2, 2048, %s36_s28, [#allocation6], %s1072_s30, %s1072_s30, %s1073_s9  }
   0xe   :  { %s1074_s12 = smov [#allocation2]  }
   0xf   :  { %s21_s13 = sshll.u32 %s1074_s12, 4  ;;  %s22_s13 = int_to_ptr.vmem [resolvable:$true] %s21_s13 }
  0x10   :  { %s1013_s14 = scalar_lea.vmem %s22_s13, 128  ;;  %p1018_p6 = scmp.lt.s32.totalorder %s22_s13, %s22_s13 }
  0x11   :  { %p1014_p5 = scmp.ne.s32.totalorder %s22_s13, %s1013_s14  ;;  %p1019_p7 = scmp.lt.s32.totalorder %s1013_s14, %s1013_s14 }
  0x13   :  { %p1020_p8 = por %p1019_p7, %p1018_p6 }
  0x15   :  { %p1021_p9 = pnand %p1020_p8, %p1014_p5 }
  0x17   :  { %1024 = shalt.err (!%p1021_p9)
}
  0x18   :  { %s1075_s15 = smov 64   ;;  %s1076_s16 = smov 4  }
  0x19   :  { %27 = dma.hbm_to_vmem [thread:$0]  %s1711_s0, 128, %s22_s13, [#allocation3], %s1075_s15, %s1075_s15, %s1076_s16  }
  0x1a   :  { %s1077_s19 = smov [#allocation7]  }
  0x1b   :  { %s47_s20 = sshll.u32 %s1077_s19, 4  ;;  %s48_s20 = int_to_ptr.vmem [resolvable:$true] %s47_s20 }
  0x1c   :  { %s1033_s2 = scalar_lea.vmem %s48_s20, 1024  ;;  %p1038_p11 = scmp.lt.s32.totalorder %s48_s20, %s48_s20 }
  0x1d   :  { %p1034_p10 = scmp.ne.s32.totalorder %s48_s20, %s1033_s2  ;;  %p1039_p12 = scmp.lt.s32.totalorder %s1033_s2, %s1033_s2 }
  0x1f   :  { %p1040_p13 = por %p1039_p12, %p1038_p11 }
  0x21   :  { %p1041_p0 = pnand %p1040_p13, %p1034_p10 }
  0x23   :  { %1044 = shalt.err (!%p1041_p0)
}
  0x24   :  { %s1078_s21 = smov 512   ;;  %s1079_s22 = smov 32  }
  0x25   :  { %53 = dma.hbm_to_vmem [thread:$0]  %s1714_s3, 1024, %s48_s20, [#allocation6], %s1078_s21, %s1078_s21, %s1079_s22  }
  0x26   :  { %1065 = dma.done.wait [#allocation3], 128  }
  0x27   :  { %1066 = vsyncadd [#allocation3], 4294967168 }
  0x28   :  { %1067 = dma.done.wait [#allocation6], 3072  }
  0x29   :  { %1068 = vsyncadd [#allocation6], 4294964224  ;;  %v1080_v0 = vmov 0.0   ;;  %v96_v1 = vld [vmem:[#allocation5 + $0x78] sm:$0xff]  ;;  %v95_v2 = vld [vmem:[#allocation5 + $0x70] sm:$0xff]  ;;  %vm97_vm0 = vcmask 523264   ;;  %v282_v37 = vlaneseq }
  0x2a   :  { %165 = vmatprep.mubr.f32.mxu0 %v1080_v0  ;;  %241 = vmatprep.mubr.f32.mxu1 %v1080_v0  ;;  %v94_v3 = vld [vmem:[#allocation5 + $0x68] sm:$0xff]  ;;  %v93_v4 = vld [vmem:[#allocation5 + $0x60] sm:$0xff]  ;;  %v92_v5 = vld [vmem:[#allocation5 + $0x58] sm:$0xff]  ;;  %vm269_vm1 = vcmask 1043456   ;;  %s1081_s27 = smov 111   ;;  %s1083_s28 = smov 112  }
  0x2b   :  { %117 = vmatprep.subr.mxu0 %v96_v1  ;;  %193 = vmatprep.subr.mxu1 %v96_v1  ;;  %v91_v6 = vld [vmem:[#allocation5 + $0x50] sm:$0xff]  ;;  %v90_v7 = vld [vmem:[#allocation5 + $0x48] sm:$0xff]  ;;  %v89_v8 = vld [vmem:[#allocation5 + $0x40] sm:$0xff]  ;;  %s1084_s29 = smov 127   ;;  %s1085_s10 = smov 15   ;;  %v1088_v35 = vmov 0  }
  0x2c   :  { %118 = vmatpush1.msra.mxu0 %v95_v2  ;;  %194 = vmatpush1.msra.mxu1 %v95_v2  ;;  %v88_v9 = vld [vmem:[#allocation5 + $0x38] sm:$0xff]  ;;  %v87_v10 = vld [vmem:[#allocation5 + $0x30] sm:$0xff]  ;;  %v86_v11 = vld [vmem:[#allocation5 + $0x28] sm:$0xff]  ;;  %s1086_s11 = smov 1   ;;  %s1087_s12 = smov 17   ;;  %v1235_v38 = vand.u32 127, %v282_v37 }
  0x2d   :  { %119 = vmatprep.subr.mxu0 %v94_v3  ;;  %195 = vmatprep.subr.mxu1 %v94_v3  ;;  %v85_v12 = vld [vmem:[#allocation5 + $0x20] sm:$0xff]  ;;  %v84_v13 = vld [vmem:[#allocation5 + $0x18] sm:$0xff]  ;;  %v83_v14 = vld [vmem:[#allocation5 + $0x10] sm:$0xff]  ;;  %v1262_v54 = vshrl.u32 %v282_v37, 7  ;;  %vm567_vm10 = vcmask 588800   ;;  %s1089_s18 = smov [#allocation8]  }
  0x2e   :  { %120 = vmatpush1.msra.mxu0 %v93_v4  ;;  %196 = vmatpush1.msra.mxu1 %v93_v4  ;;  %v82_v15 = vld [vmem:[#allocation5 + $0x8] sm:$0xff]  ;;  %v81_v16 = vld [vmem:[#allocation5] sm:$0xff]  ;;  %v80_v17 = vld [vmem:[#allocation2] sm:$0xf]  ;;  %vm515_vm2 = vcmp.lt.s32.totalorder %v1235_v38, 111  ;;  %vm449_vm3 = vcmp.lt.s32.totalorder %v1235_v38, 113 }
  0x2f   :  { %121 = vmatprep.subr.mxu0 %v92_v5  ;;  %197 = vmatprep.subr.mxu1 %v92_v5  ;;  %v173_v18 = vld [vmem:[#allocation2 + $0x4] sm:$0xf]  ;;  %v950_v22 = vld [vmem:[%s1712_s1 + $0x8] sm:$0xff]  ;;  %v1242_v41 = vld [vmem:[#allocation7 + $0x30] ss:$0 sm:$0xff]  ;;  %v456_v59 = vsub.s32 6, %v1262_v54 }
  0x30   :  { %122 = vmatpush1.msra.mxu0 %v91_v6  ;;  %198 = vmatpush1.msra.mxu1 %v91_v6  ;;  %v248_v20 = vld [vmem:[%s1712_s1] sm:$0xff]  ;;  %v255_v27 = vcombine.high %v950_v22, %v950_v22  ;;  %s1082_s1 = smov 113   ;;  %v1266_v57 = vld [vmem:[#allocation7 + $0x10] sm:$0xff]  ;;  %v489_v61 = vsub.s32 7, %v1262_v54  ;;  %vm482_vm4 = vcmp.lt.s32.totalorder %v1235_v38, 112  ;;  %vm416_vm5 = vcmp.lt.s32.totalorder %v1235_v38, 127 }
  0x31   :  { %123 = vmatprep.subr.mxu0 %v90_v7  ;;  %199 = vmatprep.subr.mxu1 %v90_v7  ;;  %v252_v31 = vcombine.high %v248_v20, %v248_v20  ;;  %v561_v36 = vld [vmem:[%s1716_s5] sm:$0xff]  ;;  %v1276_v63 = vrot.slane %v1266_v57, %v456_v59  ;;  %v1335_v37 = vld [vmem:[#allocation7] sm:$0xff]  ;;  %vm383_vm6 = vcmp.lt.s32.totalorder %v1235_v38, 1  ;;  %vm350_vm7 = vcmp.lt.s32.totalorder %v1235_v38, 15  ;;  %s935_s19 = sshll.u32 %s1089_s18, 4  ;;  %s936_s19 = int_to_ptr.vmem [resolvable:$true] %s935_s19 }
  0x32   :  { %124 = vmatpush1.msra.mxu0 %v89_v8  ;;  %200 = vmatpush1.msra.mxu1 %v89_v8  ;;  %v1244_v42 = vld [vmem:[#allocation7 + $0x38] ss:$0 sm:$0xff]  ;;  %v1282_v1 = vrot.slane %v1266_v57, %v489_v61  ;;  %vm284_vm8 = vcmp.lt.s32.totalorder %v1235_v38, 17  ;;  %vm317_vm9 = vcmp.lt.s32.totalorder %v1235_v38, 16  ;;  %p1050_p2 = scmp.lt.s32.totalorder %s936_s19, %s936_s19 }
  0x33   :  { %125 = vmatprep.subr.mxu0 %v88_v9  ;;  %201 = vmatprep.subr.mxu1 %v88_v9  ;;  %v1268_v58 = vld [vmem:[#allocation7 + $0x18] sm:$0xff] }
  0x34   :  { %126 = vmatpush1.msra.mxu0 %v87_v10  ;;  %202 = vmatpush1.msra.mxu1 %v87_v10  ;;  %v1279_v0 = vrot.slane %v1268_v58, %v456_v59  ;;  %v1285_v2 = vrot.slane %v1268_v58, %v489_v61  ;;  %v817_v38 = vld [vmem:[%s1717_s6] sm:$0xf]  ;;  %s1045_s6 = scalar_lea.vmem %s936_s19, 512 }
  0x35   :  { %127 = vmatprep.subr.mxu0 %v86_v11  ;;  %203 = vmatprep.subr.mxu1 %v86_v11  ;;  %p1046_p1 = scmp.ne.s32.totalorder %s936_s19, %s1045_s6  ;;  %p1051_p3 = scmp.lt.s32.totalorder %s1045_s6, %s1045_s6 }
  0x36   :  { %128 = vmatpush1.msra.mxu0 %v85_v12  ;;  %204 = vmatpush1.msra.mxu1 %v85_v12 }
  0x37   :  { %129 = vmatprep.subr.mxu0 %v84_v13  ;;  %205 = vmatprep.subr.mxu1 %v84_v13  ;;  %p1052_p4 = por %p1051_p3, %p1050_p2 }
  0x38   :  { %130 = vmatpush1.msra.mxu0 %v83_v14  ;;  %206 = vmatpush1.msra.mxu1 %v83_v14 }
  0x39   :  { %131 = vmatprep.subr.mxu0 %v82_v15  ;;  %207 = vmatprep.subr.mxu1 %v82_v15  ;;  %v423_v15 = vsub.s32 5, %v1262_v54  ;;  %p1053_p5 = pnand %p1052_p4, %p1046_p1 }
  0x3a   :  { %132 = vmatpush1.msra.mxu0 %v81_v16  ;;  %208 = vmatpush1.msra.mxu1 %v81_v16 }
  0x3b   :  { %948 = vmatmul.mubr.msk.f32.vlgmr.msra.gmra.mxu0 %vm97_vm0, %v80_v17  ;;  %949 = vmatmul.mubr.msk.f32.vlgmr.msra.gmra.mxu1 %vm97_vm0, %v173_v18  ;;  %v1311_v18 = vrot.slane %v1266_v57, %v423_v15 }
  0x3c   :  { %615 = vmatprep.mubr.bf16.mxu0 %v1088_v35  ;;  %656 = vmatprep.mubr.bf16.mxu1 %v1088_v35 }
  0x3d   :  { %982 = vset.pattern.permute.xlu0 %v1088_v35 }
  0xfb   :  { %v167_v19 = vpop.f32.mrf.mxu0  ;;  %v243_v21 = vpop.f32.mrf.mxu1 }
  0xfc   :  { %v261_v23 = vrot.slane %v167_v19, 4  ;;  %v263_v24 = vrot.slane %v243_v21, 4  ;;  %v1314_v19 = vrot.slane %v1268_v58, %v423_v15 }
  0xfd   :  { %v245_v25 = vpop.f32.mrf.mxu1  ;;  %v169_v30 = vpop.f32.mrf.mxu0 }
  0xfe   :  { %v1154_v26 = vsel %vm269_vm1, %v248_v20, %v261_v23  ;;  %v1157_v28 = vsel %vm269_vm1, %v950_v22, %v263_v24  ;;  %v264_v29 = vrot.slane %v245_v25, 4  ;;  %v262_v32 = vrot.slane %v169_v30, 4 }
  0xff   :  { %511 = vrot.lane.b32.xlu1 %v1157_v28, %s1081_s27  ;;  %507 = vrot.lane.b32.xlu0 %v1154_v26, %s1081_s27 }
 0x100   :  { %v1164_v33 = vsel %vm269_vm1, %v255_v27, %v264_v29  ;;  %v1171_v34 = vsel %vm269_vm1, %v252_v31, %v262_v32 }
 0x103   :  { %513 = vrot.lane.b32.xlu1 %v1164_v33, %s1081_s27  ;;  %441 = vrot.lane.b32.xlu0 %v1154_v26, %s1082_s1 }
 0x107   :  { %445 = vrot.lane.b32.xlu0 %v1157_v28, %s1082_s1  ;;  %443 = vrot.lane.b32.xlu1 %v1171_v34, %s1082_s1 }
 0x10b   :  { %474 = vrot.lane.b32.xlu0 %v1154_v26, %s1083_s28  ;;  %447 = vrot.lane.b32.xlu1 %v1164_v33, %s1082_s1 }
 0x10f   :  { %478 = vrot.lane.b32.xlu0 %v1157_v28, %s1083_s28  ;;  %476 = vrot.lane.b32.xlu1 %v1171_v34, %s1083_s28 }
 0x113   :  { %408 = vrot.lane.b32.xlu0 %v1154_v26, %s1084_s29  ;;  %480 = vrot.lane.b32.xlu1 %v1164_v33, %s1083_s28 }
 0x117   :  { %412 = vrot.lane.b32.xlu0 %v1157_v28, %s1084_s29  ;;  %410 = vrot.lane.b32.xlu1 %v1171_v34, %s1084_s29 }
 0x11b   :  { %342 = vrot.lane.b32.xlu0 %v1154_v26, %s1085_s10  ;;  %414 = vrot.lane.b32.xlu1 %v1164_v33, %s1084_s29 }
 0x11f   :  { %346 = vrot.lane.b32.xlu0 %v1157_v28, %s1085_s10  ;;  %344 = vrot.lane.b32.xlu1 %v1171_v34, %s1085_s10 }
 0x123   :  { %375 = vrot.lane.b32.xlu0 %v1154_v26, %s1086_s11  ;;  %348 = vrot.lane.b32.xlu1 %v1164_v33, %s1085_s10 }
 0x127   :  { %379 = vrot.lane.b32.xlu0 %v1157_v28, %s1086_s11  ;;  %377 = vrot.lane.b32.xlu1 %v1171_v34, %s1086_s11 }
 0x12b   :  { %381 = vrot.lane.b32.xlu1 %v1164_v33, %s1086_s11  ;;  %509 = vrot.lane.b32.xlu0 %v1171_v34, %s1081_s27 }
 0x12f   :  { %276 = vrot.lane.b32.xlu1 %v1171_v34, %s1087_s12  ;;  %274 = vrot.lane.b32.xlu0 %v1154_v26, %s1087_s12 }
 0x133   :  { %280 = vrot.lane.b32.xlu1 %v1164_v33, %s1087_s12  ;;  %278 = vrot.lane.b32.xlu0 %v1157_v28, %s1087_s12 }
 0x137   :  { %311 = vrot.lane.b32.xlu1 %v1171_v34, %s1073_s9  ;;  %309 = vrot.lane.b32.xlu0 %v1154_v26, %s1073_s9 }
 0x13b   :  { %315 = vrot.lane.b32.xlu1 %v1164_v33, %s1073_s9  ;;  %313 = vrot.lane.b32.xlu0 %v1157_v28, %s1073_s9 }
 0x13f   :  { %564 = vperm.xlu0 %982, %v561_v36  }
 0x171   :  { %v1237_v39 = vpop.permute.xlu1 %511  ;;  %v1239_v40 = vpop.permute.xlu0 %507 }
 0x175   :  { %v514_v43 = vpop.permute.xlu1 %513  ;;  %v1246_v44 = vpop.permute.xlu0 %441 }
 0x176   :  { %v516_v45 = vsel %vm515_vm2, %v1237_v39, %v514_v43  ;;  %v519_v46 = vsel %vm515_vm2, %v514_v43, %v1239_v40  ;;  %v1337_v43 = vld [vmem:[#allocation7 + $0x8] sm:$0xff] }
 0x177   :  { %v538_v47 = vmul.f32 %v1242_v41, %v516_v45  ;;  %v539_v48 = vmul.f32 %v1244_v42, %v519_v46  ;;  %v390_v45 = vsub.s32 3, %v1262_v54  ;;  %v357_v46 = vsub.s32 2, %v1262_v54 }
 0x179   :  { %v558_v49 = vpack.c.bf16 %v538_v47, %v538_v47  ;;  %v559_v50 = vpack.c.bf16 %v539_v48, %v539_v48  ;;  %v1256_v51 = vpop.permute.xlu0 %445  ;;  %v1258_v52 = vpop.permute.xlu1 %443  ;;  %v1349_v47 = vrot.slane %v1335_v37, %v489_v61  ;;  %v1352_v48 = vrot.slane %v1337_v43, %v489_v61 }
 0x17a   :  { %v1368_v61 = vrot.slane %v1268_v58, %v357_v46 }
 0x17b   :  { %957 = vmatprep.subr.msk.bf16.mxu1 %vm269_vm1, %v559_v50  ;;  %v578_v53 = vsel %vm269_vm1, %v558_v49, 0 }
 0x17c   :  { %631 = vmatpush1.bf16.msra.mxu1 %v578_v53 }
 0x17d   :  { %v1264_v55 = vpop.permute.xlu0 %474  ;;  %v448_v56 = vpop.permute.xlu1 %447 }
 0x17e   :  { %v450_v3 = vsel %vm449_vm3, %v1256_v51, %v448_v56  ;;  %v453_v4 = vsel %vm449_vm3, %v448_v56, %v1246_v44  ;;  %v1358_v56 = vrot.slane %v1335_v37, %v423_v15 }
 0x17f   :  { %v472_v9 = vmul.f32 %v1276_v63, %v450_v3  ;;  %v473_v10 = vmul.f32 %v1279_v0, %v453_v4  ;;  %v1365_v3 = vrot.slane %v1337_v43, %v423_v15 }
 0x181   :  { %v479_v60 = vpop.permute.xlu0 %478  ;;  %v1272_v62 = vpop.permute.xlu1 %476 }
 0x182   :  { %v484_v53 = vsel %vm482_vm4, %v1272_v62, %v479_v60 }
 0x183   :  { %v504_v15 = vmul.f32 %v1352_v48, %v484_v53 }
 0x185   :  { %v1294_v5 = vpop.permute.xlu0 %408  ;;  %v481_v6 = vpop.permute.xlu1 %480 }
 0x186   :  { %v483_v7 = vsel %vm482_vm4, %v479_v60, %v481_v6  ;;  %v486_v8 = vsel %vm482_vm4, %v481_v6, %v1264_v55  ;;  %v1373_v6 = vrot.slane %v1268_v58, %v390_v45  ;;  %v1376_v60 = vrot.slane %v1337_v43, %v357_v46 }
 0x187   :  { %v505_v11 = vmul.f32 %v1282_v1, %v483_v7  ;;  %v506_v12 = vmul.f32 %v1285_v2, %v486_v8  ;;  %v1379_v7 = vrot.slane %v1266_v57, %v357_v46 }
 0x189   :  { %v554_v13 = vpack.c.bf16 %v505_v11, %v472_v9  ;;  %v1305_v14 = vpop.permute.xlu0 %412  ;;  %v1308_v16 = vpop.permute.xlu1 %410  ;;  %v555_v17 = vpack.c.bf16 %v506_v12, %v473_v10  ;;  %v1385_v9 = vrot.slane %v1335_v37, %v357_v46  ;;  %v1387_v10 = vld [vmem:[#allocation7 + $0x20] ss:$0 sm:$0xff]  ;;  %v1389_v11 = vld [vmem:[#allocation7 + $0x28] ss:$0 sm:$0xff]  ;;  %v451_v12 = vsel %vm449_vm3, %v1258_v52, %v1256_v51 }
 0x18a   :  { %v291_v46 = vsub.s32 0, %v1262_v54 }
 0x18b   :  { %632 = vmatprep.subr.bf16.mxu1 %v555_v17 }
 0x18c   :  { %633 = vmatpush1.bf16.msra.mxu1 %v554_v13  ;;  %v485_v13 = vsel %vm482_vm4, %v1264_v55, %v1272_v62 }
 0x18d   :  { %v1317_v20 = vpop.permute.xlu0 %342  ;;  %v415_v21 = vpop.permute.xlu1 %414 }
 0x18e   :  { %v417_v22 = vsel %vm416_vm5, %v1305_v14, %v415_v21  ;;  %v420_v23 = vsel %vm416_vm5, %v415_v21, %v1294_v5 }
 0x18f   :  { %v439_v24 = vmul.f32 %v1311_v18, %v417_v22  ;;  %v440_v25 = vmul.f32 %v1314_v19, %v420_v23 }
 0x191   :  { %v550_v27 = vpack.c.bf16 %v439_v24, %v1157_v28  ;;  %v347_v29 = vpop.permute.xlu0 %346  ;;  %v1328_v30 = vpop.permute.xlu1 %344  ;;  %v551_v31 = vpack.c.bf16 %v440_v25, %v1164_v33  ;;  %v1343_v28 = vrot.slane %v1335_v37, %v456_v59  ;;  %v1346_v33 = vrot.slane %v1337_v43, %v456_v59 }
 0x192   :  { %v1362_v59 = vrot.slane %v1266_v57, %v390_v45  ;;  %v352_v17 = vsel %vm350_vm7, %v1328_v30, %v347_v29 }
 0x193   :  { %634 = vmatprep.subr.bf16.mxu1 %v551_v31  ;;  %v452_v31 = vsel %vm449_vm3, %v1246_v44, %v1258_v52  ;;  %v419_v44 = vsel %vm416_vm5, %v1294_v5, %v1308_v16  ;;  %v1433_v52 = vrot.slane %v1337_v43, %v390_v45 }
 0x194   :  { %635 = vmatpush1.bf16.msra.mxu1 %v550_v27 }
 0x195   :  { %v1331_v32 = vpop.permute.xlu0 %375  ;;  %v1333_v36 = vpop.permute.xlu1 %348 }
 0x196   :  { %v351_v8 = vsel %vm350_vm7, %v347_v29, %v1333_v36 }
 0x197   :  { %v374_v62 = vmul.f32 %v1368_v61, %v351_v8 }
 0x199   :  { %v380_v49 = vpop.permute.xlu0 %379  ;;  %v378_v50 = vpop.permute.xlu1 %377 }
 0x19a   :  { %v385_v4 = vsel %vm383_vm6, %v378_v50, %v380_v49  ;;  %v386_v5 = vsel %vm383_vm6, %v1331_v32, %v378_v50 }
 0x19b   :  { %v406_v23 = vmul.f32 %v1362_v59, %v385_v4 }
 0x19d   :  { %v382_v21 = vpop.permute.xlu1 %381  ;;  %v510_v22 = vpop.permute.xlu0 %509 }
 0x19e   :  { %v384_v24 = vsel %vm383_vm6, %v380_v49, %v382_v21  ;;  %v517_v51 = vsel %vm515_vm2, %v510_v22, %v1237_v39  ;;  %v518_v55 = vsel %vm515_vm2, %v1239_v40, %v510_v22  ;;  %v418_v39 = vsel %vm416_vm5, %v1308_v16, %v1305_v14 }
 0x19f   :  { %v407_v25 = vmul.f32 %v1373_v6, %v384_v24  ;;  %v536_v27 = vmul.f32 %v1387_v10, %v518_v55  ;;  %v537_v29 = vmul.f32 %v1389_v11, %v517_v51  ;;  %v373_v40 = vmul.f32 %v1379_v7, %v352_v17 }
 0x1a0   :  { %v471_v49 = vmul.f32 %v1346_v33, %v451_v12  ;;  %v503_v51 = vmul.f32 %v1349_v47, %v485_v13  ;;  %v438_v17 = vmul.f32 %v1365_v3, %v418_v39  ;;  %v470_v13 = vmul.f32 %v1343_v28, %v452_v31 }
 0x1a1   :  { %v556_v53 = vpack.c.bf16 %v536_v27, %v536_v27  ;;  %v557_v4 = vpack.c.bf16 %v537_v29, %v537_v29  ;;  %v277_v8 = vpop.permute.xlu1 %276  ;;  %v275_v22 = vpop.permute.xlu0 %274  ;;  %v547_v24 = vpack.c.bf16 %v407_v25, %v374_v62  ;;  %v546_v14 = vpack.c.bf16 %v406_v23, %v373_v40 }
 0x1a2   :  { %v553_v55 = vpack.c.bf16 %v504_v15, %v471_v49  ;;  %v324_v62 = vsub.s32 1, %v1262_v54  ;;  %v1444_v16 = vrot.slane %v1335_v37, %v390_v45  ;;  %v437_v23 = vmul.f32 %v1358_v56, %v419_v44 }
 0x1a3   :  { %955 = vmatprep.subr.msk.bf16.mxu0 %vm269_vm1, %v557_v4  ;;  %636 = vmatprep.subr.bf16.mxu1 %v547_v24  ;;  %v572_v12 = vsel %vm269_vm1, %v556_v53, 0  ;;  %v1449_v25 = vrot.slane %v1337_v43, %v291_v46  ;;  %v1452_v54 = vrot.slane %v1335_v37, %v291_v46  ;;  %v552_v29 = vpack.c.bf16 %v503_v51, %v470_v13 }
 0x1a4   :  { %590 = vmatpush1.bf16.msra.mxu0 %v572_v12  ;;  %637 = vmatpush1.bf16.msra.mxu1 %v546_v14  ;;  %v353_v45 = vsel %vm350_vm7, %v1317_v20, %v1328_v30  ;;  %v387_v50 = vsel %vm383_vm6, %v382_v21, %v1331_v32  ;;  %v1462_v31 = vrot.slane %v1266_v57, %v291_v46 }
 0x1a5   :  { %v281_v15 = vpop.permute.xlu1 %280  ;;  %v279_v27 = vpop.permute.xlu0 %278  ;;  %591 = vmatprep.subr.bf16.mxu0 %v553_v55  ;;  %v405_v39 = vmul.f32 %v1433_v52, %v386_v5  ;;  %v1467_v40 = vrot.slane %v1337_v43, %v324_v62  ;;  %v549_v49 = vpack.c.bf16 %v438_v17, %v1171_v34  ;;  %v354_v30 = vsel %vm350_vm7, %v1333_v36, %v1317_v20 }
 0x1a6   :  { %v1475_v53 = vrot.slane %v1268_v58, %v291_v46  ;;  %v1478_v32 = vrot.slane %v1335_v37, %v324_v62  ;;  %v1481_v21 = vrot.slane %v1266_v57, %v324_v62  ;;  %v548_v43 = vpack.c.bf16 %v437_v23, %v1154_v26 }
 0x1a7   :  { %v372_v4 = vmul.f32 %v1376_v60, %v353_v45  ;;  %v404_v34 = vmul.f32 %v1444_v16, %v387_v50  ;;  %v1487_v20 = vrot.slane %v1268_v58, %v324_v62  ;;  %v287_v36 = vsel %vm284_vm8, %v275_v22, %v277_v8 }
 0x1a8   :  { %592 = vmatpush1.bf16.msra.mxu0 %v552_v29  ;;  %v288_v37 = vsel %vm284_vm8, %v281_v15, %v275_v22  ;;  %v286_v57 = vsel %vm284_vm8, %v277_v8, %v279_v27  ;;  %v371_v46 = vmul.f32 %v1385_v9, %v354_v30  ;;  %v285_v44 = vsel %vm284_vm8, %v279_v27, %v281_v15 }
 0x1a9   :  { %v312_v24 = vpop.permute.xlu1 %311  ;;  %v310_v51 = vpop.permute.xlu0 %309  ;;  %593 = vmatprep.subr.bf16.mxu0 %v549_v49  ;;  %v545_v14 = vpack.c.bf16 %v405_v39, %v372_v4  ;;  %v306_v12 = vmul.f32 %v1449_v25, %v287_v36  ;;  %v305_v22 = vmul.f32 %v1452_v54, %v288_v37  ;;  %v307_v55 = vmul.f32 %v1462_v31, %v286_v57 }
 0x1aa   :  { %v320_v26 = vsel %vm317_vm9, %v310_v51, %v312_v24  ;;  %v544_v17 = vpack.c.bf16 %v404_v34, %v371_v46  ;;  %v308_v13 = vmul.f32 %v1475_v53, %v285_v44 }
 0x1ab   :  { %v339_v58 = vmul.f32 %v1467_v40, %v320_v26 }
 0x1ac   :  { %594 = vmatpush1.bf16.msra.mxu0 %v548_v43  ;;  %v560_v43 = vld [vmem:[%s1715_s4] sm:$0xf] }
 0x1ad   :  { %v316_v8 = vpop.permute.xlu1 %315  ;;  %v314_v62 = vpop.permute.xlu0 %313  ;;  %595 = vmatprep.subr.bf16.mxu0 %v545_v14  ;;  %v541_v50 = vpack.c.bf16 %v339_v58, %v306_v12 }
 0x1ae   :  { %v321_v5 = vsel %vm317_vm9, %v316_v8, %v310_v51  ;;  %v318_v23 = vsel %vm317_vm9, %v314_v62, %v316_v8  ;;  %v319_v15 = vsel %vm317_vm9, %v312_v24, %v314_v62  ;;  %v818_v8 = vld [vmem:[%s1718_s7] sm:$0xff] }
 0x1af   :  { %v338_v27 = vmul.f32 %v1478_v32, %v321_v5  ;;  %v340_v29 = vmul.f32 %v1481_v21, %v319_v15  ;;  %v341_v45 = vmul.f32 %v1487_v20, %v318_v23 }
 0x1b0   :  { %596 = vmatpush1.bf16.msra.mxu0 %v544_v17 }
 0x1b1   :  { %v540_v39 = vpack.c.bf16 %v338_v27, %v305_v22  ;;  %v542_v49 = vpack.c.bf16 %v340_v29, %v307_v55  ;;  %597 = vmatprep.subr.bf16.mxu0 %v541_v50  ;;  %v543_v30 = vpack.c.bf16 %v341_v45, %v308_v13 }
 0x1b3   :  { %638 = vmatprep.subr.bf16.mxu1 %v543_v30 }
 0x1b4   :  { %598 = vmatpush1.bf16.msra.mxu0 %v540_v39  ;;  %639 = vmatpush1.bf16.msra.mxu1 %v542_v49 }
 0x1b7   :  { %956 = vmatmul.mubr.msk.bf16.vlgmr.msra.gmra.mxu0 %vm567_vm10, %v560_v43  ;;  %958 = vmatmul.mubr.msk.bf16.vlgmr.msra.gmra.mxu1 %vm567_vm10, %v560_v43 }
 0x1b8   :  { %871 = vmatprep.mubr.bf16.mxu0 %v1088_v35  ;;  %912 = vmatprep.mubr.bf16.mxu1 %v1088_v35 }
 0x1ba   :  { %v565_v4 = vpop.permute.xlu0 %564 }
 0x277   :  { %v617_v34 = vpop.f32.mrf.mxu0  ;;  %v658_v24 = vpop.f32.mrf.mxu1 }
 0x278   :  { %v618_v51 = vadd.f32 %v617_v34, %v565_v4  ;;  %v659_v36 = vadd.f32 %v658_v24, %v565_v4 }
 0x279   :  { %v619_v37 = vpop.f32.mrf.mxu0  ;;  %v660_v57 = vpop.f32.mrf.mxu1 }
 0x27a   :  { %v1521_v26 = vmax.f32 %v618_v51, 0.0  ;;  %v1523_v46 = vmax.f32 %v659_v36, 0.0  ;;  %v620_v44 = vadd.f32 %v619_v37, %v565_v4  ;;  %v661_v22 = vadd.f32 %v660_v57, %v565_v4 }
 0x27b   :  { %v621_v58 = vpop.f32.mrf.mxu0  ;;  %v662_v14 = vpop.f32.mrf.mxu1 }
 0x27c   :  { %785 = vrot.lane.b32.xlu0 %v1523_v46, %s1081_s27  ;;  %781 = vrot.lane.b32.xlu1 %v1521_v26, %s1081_s27  ;;  %v1529_v12 = vmax.f32 %v620_v44, 0.0  ;;  %v1535_v55 = vmax.f32 %v661_v22, 0.0 }
 0x27d   :  { %v622_v35 = vpop.f32.mrf.mxu0  ;;  %v663_v17 = vpop.f32.mrf.mxu1 }
 0x280   :  { %749 = vrot.lane.b32.xlu0 %v1521_v26, %s1082_s1  ;;  %783 = vrot.lane.b32.xlu1 %v1529_v12, %s1081_s27 }
 0x284   :  { %753 = vrot.lane.b32.xlu0 %v1523_v46, %s1082_s1  ;;  %787 = vrot.lane.b32.xlu1 %v1535_v55, %s1081_s27 }
 0x288   :  { %765 = vrot.lane.b32.xlu0 %v1521_v26, %s1083_s28  ;;  %751 = vrot.lane.b32.xlu1 %v1529_v12, %s1082_s1 }
 0x28c   :  { %769 = vrot.lane.b32.xlu0 %v1523_v46, %s1083_s28  ;;  %755 = vrot.lane.b32.xlu1 %v1535_v55, %s1082_s1 }
 0x290   :  { %733 = vrot.lane.b32.xlu0 %v1521_v26, %s1084_s29  ;;  %767 = vrot.lane.b32.xlu1 %v1529_v12, %s1083_s28 }
 0x294   :  { %737 = vrot.lane.b32.xlu0 %v1523_v46, %s1084_s29  ;;  %771 = vrot.lane.b32.xlu1 %v1535_v55, %s1083_s28 }
 0x298   :  { %701 = vrot.lane.b32.xlu0 %v1521_v26, %s1085_s10  ;;  %735 = vrot.lane.b32.xlu1 %v1529_v12, %s1084_s29 }
 0x29c   :  { %705 = vrot.lane.b32.xlu0 %v1523_v46, %s1085_s10  ;;  %739 = vrot.lane.b32.xlu1 %v1535_v55, %s1084_s29 }
 0x2a0   :  { %717 = vrot.lane.b32.xlu0 %v1521_v26, %s1086_s11  ;;  %703 = vrot.lane.b32.xlu1 %v1529_v12, %s1085_s10 }
 0x2a4   :  { %721 = vrot.lane.b32.xlu0 %v1523_v46, %s1086_s11  ;;  %707 = vrot.lane.b32.xlu1 %v1535_v55, %s1085_s10 }
 0x2a8   :  { %669 = vrot.lane.b32.xlu0 %v1521_v26, %s1087_s12  ;;  %719 = vrot.lane.b32.xlu1 %v1529_v12, %s1086_s11 }
 0x2ac   :  { %673 = vrot.lane.b32.xlu0 %v1523_v46, %s1087_s12  ;;  %723 = vrot.lane.b32.xlu1 %v1535_v55, %s1086_s11 }
 0x2b0   :  { %685 = vrot.lane.b32.xlu0 %v1521_v26, %s1073_s9  ;;  %671 = vrot.lane.b32.xlu1 %v1529_v12, %s1087_s12 }
 0x2b4   :  { %689 = vrot.lane.b32.xlu0 %v1523_v46, %s1073_s9  ;;  %675 = vrot.lane.b32.xlu1 %v1535_v55, %s1087_s12 }
 0x2b8   :  { %821 = vperm.xlu0 %982, %v818_v8   ;;  %687 = vrot.lane.b32.xlu1 %v1529_v12, %s1073_s9 }
 0x2bc   :  { %691 = vrot.lane.b32.xlu1 %v1535_v55, %s1073_s9 }
 0x2ee   :  { %v786_v62 = vpop.permute.xlu0 %785  ;;  %v782_v13 = vpop.permute.xlu1 %781 }
 0x2f2   :  { %v750_v5 = vpop.permute.xlu0 %749  ;;  %v784_v23 = vpop.permute.xlu1 %783 }
 0x2f3   :  { %v790_v15 = vsel %vm515_vm2, %v784_v23, %v786_v62  ;;  %v791_v27 = vsel %vm515_vm2, %v782_v13, %v784_v23 }
 0x2f4   :  { %v793_v29 = vmul.f32 %v1387_v10, %v791_v27  ;;  %v794_v45 = vmul.f32 %v1389_v11, %v790_v15 }
 0x2f6   :  { %v813_v50 = vpack.c.bf16 %v793_v29, %v793_v29  ;;  %v814_v39 = vpack.c.bf16 %v794_v45, %v794_v45  ;;  %v754_v49 = vpop.permute.xlu0 %753  ;;  %v788_v30 = vpop.permute.xlu1 %787 }
 0x2f7   :  { %v789_v43 = vsel %vm515_vm2, %v786_v62, %v788_v30  ;;  %v792_v4 = vsel %vm515_vm2, %v788_v30, %v782_v13 }
 0x2f8   :  { %v795_v34 = vmul.f32 %v1242_v41, %v789_v43  ;;  %v796_v24 = vmul.f32 %v1244_v42, %v792_v4  ;;  %959 = vmatprep.subr.msk.bf16.mxu0 %vm269_vm1, %v814_v39  ;;  %v828_v10 = vsel %vm269_vm1, %v813_v50, 0 }
 0x2f9   :  { %846 = vmatpush1.bf16.msra.mxu0 %v828_v10 }
 0x2fa   :  { %v815_v11 = vpack.c.bf16 %v795_v34, %v795_v34  ;;  %v816_v51 = vpack.c.bf16 %v796_v24, %v796_v24  ;;  %v766_v36 = vpop.permute.xlu0 %765  ;;  %v752_v37 = vpop.permute.xlu1 %751 }
 0x2fb   :  { %v758_v41 = vsel %vm449_vm3, %v752_v37, %v754_v49  ;;  %v759_v42 = vsel %vm449_vm3, %v750_v5, %v752_v37 }
 0x2fc   :  { %961 = vmatprep.subr.msk.bf16.mxu1 %vm269_vm1, %v816_v51  ;;  %v834_v57 = vsel %vm269_vm1, %v815_v11, 0  ;;  %v761_v8 = vmul.f32 %v759_v42, %v1343_v28  ;;  %v762_v62 = vmul.f32 %v758_v41, %v1346_v33 }
 0x2fd   :  { %887 = vmatpush1.bf16.msra.mxu1 %v834_v57 }
 0x2fe   :  { %v770_v44 = vpop.permute.xlu0 %769  ;;  %v756_v58 = vpop.permute.xlu1 %755 }
 0x2ff   :  { %v757_v15 = vsel %vm449_vm3, %v754_v49, %v756_v58  ;;  %v760_v27 = vsel %vm449_vm3, %v756_v58, %v750_v5 }
 0x300   :  { %v763_v33 = vmul.f32 %v757_v15, %v1276_v63 }
 0x302   :  { %v734_v14 = vpop.permute.xlu0 %733  ;;  %v768_v35 = vpop.permute.xlu1 %767 }
 0x303   :  { %v774_v17 = vsel %vm482_vm4, %v768_v35, %v770_v44  ;;  %v775_v22 = vsel %vm482_vm4, %v766_v36, %v768_v35 }
 0x304   :  { %v777_v13 = vmul.f32 %v775_v22, %v1349_v47  ;;  %v778_v23 = vmul.f32 %v774_v17, %v1352_v48  ;;  %v764_v47 = vmul.f32 %v760_v27, %v1279_v0 }
 0x306   :  { %v809_v29 = vpack.c.bf16 %v777_v13, %v761_v8  ;;  %v738_v45 = vpop.permute.xlu0 %737  ;;  %v772_v50 = vpop.permute.xlu1 %771  ;;  %v810_v39 = vpack.c.bf16 %v778_v23, %v762_v62 }
 0x307   :  { %v773_v30 = vsel %vm482_vm4, %v770_v44, %v772_v50  ;;  %v776_v28 = vsel %vm482_vm4, %v772_v50, %v766_v36 }
 0x308   :  { %v779_v48 = vmul.f32 %v773_v30, %v1282_v1  ;;  %v780_v49 = vmul.f32 %v776_v28, %v1285_v2  ;;  %847 = vmatprep.subr.bf16.mxu0 %v810_v39 }
 0x309   :  { %848 = vmatpush1.bf16.msra.mxu0 %v809_v29 }
 0x30a   :  { %v811_v5 = vpack.c.bf16 %v779_v48, %v763_v33  ;;  %v702_v43 = vpop.permute.xlu0 %701  ;;  %v736_v4 = vpop.permute.xlu1 %735  ;;  %v812_v34 = vpack.c.bf16 %v780_v49, %v764_v47 }
 0x30b   :  { %v742_v24 = vsel %vm416_vm5, %v736_v4, %v738_v45  ;;  %v743_v10 = vsel %vm416_vm5, %v734_v14, %v736_v4 }
 0x30c   :  { %v745_v63 = vmul.f32 %v743_v10, %v1358_v56  ;;  %v746_v0 = vmul.f32 %v742_v24, %v1365_v3  ;;  %888 = vmatprep.subr.bf16.mxu1 %v812_v34 }
 0x30d   :  { %889 = vmatpush1.bf16.msra.mxu1 %v811_v5 }
 0x30e   :  { %v805_v1 = vpack.c.bf16 %v745_v63, %v1521_v26  ;;  %v706_v2 = vpop.permute.xlu0 %705  ;;  %v740_v11 = vpop.permute.xlu1 %739  ;;  %v806_v51 = vpack.c.bf16 %v746_v0, %v1529_v12 }
 0x30f   :  { %v741_v36 = vsel %vm416_vm5, %v738_v45, %v740_v11  ;;  %v744_v37 = vsel %vm416_vm5, %v740_v11, %v734_v14 }
 0x310   :  { %v747_v57 = vmul.f32 %v741_v36, %v1311_v18  ;;  %v748_v56 = vmul.f32 %v744_v37, %v1314_v19  ;;  %849 = vmatprep.subr.bf16.mxu0 %v806_v51 }
 0x311   :  { %850 = vmatpush1.bf16.msra.mxu0 %v805_v1 }
 0x312   :  { %v807_v3 = vpack.c.bf16 %v747_v57, %v1523_v46  ;;  %v718_v44 = vpop.permute.xlu0 %717  ;;  %v704_v26 = vpop.permute.xlu1 %703  ;;  %v808_v58 = vpack.c.bf16 %v748_v56, %v1535_v55 }
 0x313   :  { %v711_v42 = vsel %vm350_vm7, %v702_v43, %v704_v26  ;;  %v710_v8 = vsel %vm350_vm7, %v704_v26, %v706_v2 }
 0x314   :  { %890 = vmatprep.subr.bf16.mxu1 %v808_v58  ;;  %v714_v19 = vmul.f32 %v711_v42, %v1376_v60  ;;  %v715_v39 = vmul.f32 %v710_v8, %v1379_v7 }
 0x315   :  { %891 = vmatpush1.bf16.msra.mxu1 %v807_v3 }
 0x316   :  { %v722_v12 = vpop.permute.xlu0 %721  ;;  %v708_v41 = vpop.permute.xlu1 %707 }
 0x317   :  { %v709_v55 = vsel %vm350_vm7, %v706_v2, %v708_v41  ;;  %v712_v22 = vsel %vm350_vm7, %v708_v41, %v702_v43 }
 0x318   :  { %v713_v27 = vmul.f32 %v712_v22, %v1385_v9  ;;  %v716_v29 = vmul.f32 %v709_v55, %v1368_v61 }
 0x31a   :  { %v670_v14 = vpop.permute.xlu0 %669  ;;  %v720_v35 = vpop.permute.xlu1 %719 }
 0x31b   :  { %v727_v18 = vsel %vm383_vm6, %v718_v44, %v720_v35  ;;  %v726_v46 = vsel %vm383_vm6, %v720_v35, %v722_v12 }
 0x31c   :  { %v730_v17 = vmul.f32 %v727_v18, %v1433_v52  ;;  %v731_v23 = vmul.f32 %v726_v46, %v1362_v59 }
 0x31e   :  { %v724_v62 = vpop.permute.xlu1 %723  ;;  %v802_v13 = vpack.c.bf16 %v730_v17, %v714_v19  ;;  %v674_v15 = vpop.permute.xlu0 %673  ;;  %v803_v33 = vpack.c.bf16 %v731_v23, %v715_v39 }
 0x31f   :  { %v725_v60 = vsel %vm383_vm6, %v722_v12, %v724_v62  ;;  %v728_v52 = vsel %vm383_vm6, %v724_v62, %v718_v44 }
 0x320   :  { %v729_v45 = vmul.f32 %v728_v52, %v1444_v16  ;;  %v732_v50 = vmul.f32 %v725_v60, %v1373_v6  ;;  %851 = vmatprep.subr.bf16.mxu0 %v802_v13 }
 0x322   :  { %v801_v30 = vpack.c.bf16 %v729_v45, %v713_v27  ;;  %v672_v59 = vpop.permute.xlu1 %671  ;;  %v804_v28 = vpack.c.bf16 %v732_v50, %v716_v29  ;;  %v686_v47 = vpop.permute.xlu0 %685 }
 0x323   :  { %v679_v9 = vsel %vm284_vm8, %v670_v14, %v672_v59  ;;  %v678_v34 = vsel %vm284_vm8, %v672_v59, %v674_v15 }
 0x324   :  { %852 = vmatpush1.bf16.msra.mxu0 %v801_v30  ;;  %892 = vmatprep.subr.bf16.mxu1 %v804_v28  ;;  %v682_v16 = vmul.f32 %v679_v9, %v1449_v25  ;;  %v683_v51 = vmul.f32 %v678_v34, %v1462_v31 }
 0x325   :  { %893 = vmatpush1.bf16.msra.mxu1 %v803_v33 }
 0x326   :  { %v676_v48 = vpop.permute.xlu1 %675  ;;  %v690_v49 = vpop.permute.xlu0 %689 }
 0x327   :  { %v677_v43 = vsel %vm284_vm8, %v674_v15, %v676_v48  ;;  %v680_v4 = vsel %vm284_vm8, %v676_v48, %v670_v14 }
 0x328   :  { %v684_v1 = vmul.f32 %v677_v43, %v1475_v53 }
 0x32a   :  { %v688_v61 = vpop.permute.xlu1 %687 }
 0x32b   :  { %v695_v6 = vsel %vm317_vm9, %v686_v47, %v688_v61  ;;  %v694_v7 = vsel %vm317_vm9, %v688_v61, %v690_v49 }
 0x32c   :  { %v698_v5 = vmul.f32 %v695_v6, %v1467_v40  ;;  %v699_v63 = vmul.f32 %v694_v7, %v1481_v21  ;;  %v681_v40 = vmul.f32 %v680_v4, %v1452_v54 }
 0x32e   :  { %v692_v24 = vpop.permute.xlu1 %691  ;;  %v798_v10 = vpack.c.bf16 %v698_v5, %v682_v16  ;;  %v799_v21 = vpack.c.bf16 %v699_v63, %v683_v51 }
 0x32f   :  { %v693_v25 = vsel %vm317_vm9, %v690_v49, %v692_v24  ;;  %v696_v0 = vsel %vm317_vm9, %v692_v24, %v686_v47 }
 0x330   :  { %v697_v2 = vmul.f32 %v696_v0, %v1478_v32  ;;  %v700_v11 = vmul.f32 %v693_v25, %v1487_v20  ;;  %853 = vmatprep.subr.bf16.mxu0 %v798_v10 }
 0x332   :  { %v797_v36 = vpack.c.bf16 %v697_v2, %v681_v40  ;;  %v800_v37 = vpack.c.bf16 %v700_v11, %v684_v1 }
 0x333   :  { %v822_v54 = vpop.permute.xlu0 %821 }
 0x334   :  { %854 = vmatpush1.bf16.msra.mxu0 %v797_v36  ;;  %894 = vmatprep.subr.bf16.mxu1 %v800_v37 }
 0x335   :  { %895 = vmatpush1.bf16.msra.mxu1 %v799_v21 }
 0x337   :  { %960 = vmatmul.mubr.msk.bf16.vlgmr.msra.gmra.mxu0 %vm567_vm10, %v817_v38 }
 0x338   :  { %962 = vmatmul.mubr.msk.bf16.vlgmr.msra.gmra.mxu1 %vm567_vm10, %v817_v38 }
 0x3f7   :  { %v873_v53 = vpop.f32.mrf.mxu0 }
 0x3f8   :  { %v874_v32 = vadd.f32 %v873_v53, %v822_v54  ;;  %v914_v20 = vpop.f32.mrf.mxu1 }
 0x3f9   :  { %v915_v57 = vadd.f32 %v914_v20, %v822_v54  ;;  %v875_v31 = vpop.f32.mrf.mxu0 }
 0x3fa   :  { %v921_v56 = vmax.f32 %v874_v32, 0.0  ;;  %v876_v3 = vadd.f32 %v875_v31, %v822_v54  ;;  %v916_v44 = vpop.f32.mrf.mxu1 }
 0x3fb   :  { %v923_v26 = vmax.f32 %v915_v57, 0.0  ;;  %v917_v58 = vadd.f32 %v916_v44, %v822_v54  ;;  %v877_v12 = vpop.f32.mrf.mxu0 }
 0x3fc   :  { %925 = vst [vmem:[#allocation8] sm:$0xff] %v921_v56  ;;  %v922_v41 = vmax.f32 %v876_v3, 0.0  ;;  %v918_v42 = vpop.f32.mrf.mxu1 }
 0x3fd   :  { %928 = vst [vmem:[#allocation8 + $0x10] sm:$0xff] %v923_v26  ;;  %v924_v14 = vmax.f32 %v917_v58, 0.0  ;;  %v878_v35 = vpop.f32.mrf.mxu0 }
 0x3fe   :  { %926 = vst [vmem:[#allocation8 + $0x8] sm:$0xff] %v922_v41  ;;  %v919_v18 = vpop.f32.mrf.mxu1 }
 0x3ff   :  { %929 = vst [vmem:[#allocation8 + $0x18] sm:$0xff] %v924_v14 }
 0x400   :  { %1056 = shalt.err (!%p1053_p5)
}
 0x401   :  { %941 = dma.vmem_to_hbm [thread:$0]  %s936_s19, 512, %s1719_s8, [#allocation4], %s1072_s30, %s1072_s30, %s1073_s9  }
 0x402   :  { %1069 = dma.done.wait [#allocation4], 512  }
 0x403   :  { %1070 = vsyncadd [#allocation4], 4294966784 }
 0x404   :  { %945 = vsyncpa [#allocation3], 1 }
 0x405   :  { %946 = vsyncpa [#allocation6], 1 }
 0x406   :  { %947 = vsyncpa [#allocation4], 1 }

</bundles_post_ra>
